<compile_context>
chip_gen: v6e
topology: v6e:2x2x1
jax: 0.10.0
libtpu: 0.0.40
codegen_flags: <defaults>
</compile_context>

<pallas_src>
import functools

import jax
import jax.numpy as jnp
from jax.experimental import pallas as pl
from jax.experimental.pallas import tpu as pltpu


# ------------------------------------------------------------------ kernel ---
def _double_conv_kernel(xi_ref, w1_ref, w2_ref, bn_ref, o_ref, *, B, H, WCm, WCo):
    """Whole batch in one step.  Rows are (b, y) flattened; lanes are (x, c).

    xi_ref : (B*H, 3*W*Cin)     bf16  y-im2col input (dy folded into K by wrapper)
    w1_ref : (3*W*Cin, W*Cmid)  bf16  banded weights (dy and dx folded into K)
    w2_ref : (3*W*Cmid, W*Cout) bf16
    bn_ref : (4, max(W*Cmid, W*Cout)) f32  rows = [s1, b1, s2, b2], tiled over x
    o_ref  : (B*H, W*Cout)      f32   lane-dense output
    """
    f32 = jnp.float32
    BH = B * H

    s1 = bn_ref[0:1, :WCm]
    b1 = bn_ref[1:2, :WCm]
    s2 = bn_ref[2:3, :WCo]
    b2 = bn_ref[3:4, :WCo]

    # ---- conv1 + BN + ReLU: one MXU matmul, f32 epilogue on the VPU ---------
    acc1 = jnp.dot(xi_ref[...], w1_ref[...], preferred_element_type=f32)
    mid = jnp.maximum(acc1 * s1 + b1, 0.0)                       # (BH, WCm) f32

    # ---- build conv2's y-im2col LHS in vregs (no VMEM scratch) --------------
    # dy = 0 / 2 operands are sublane rolls of mid (XLU slot); rows that would
    # wrap across a batch/image boundary are zeroed (SAME zero padding in y).
    rows = jax.lax.broadcasted_iota(jnp.int32, (BH, 1), 0)
    is_first = rows == 0
    is_last = rows == H - 1
    for b in range(1, B):
        is_first = jnp.logical_or(is_first, rows == b * H)
        is_last = jnp.logical_or(is_last, rows == b * H + H - 1)

    up = jnp.where(is_first, 0.0, pltpu.roll(mid, 1, 0))         # row y -> mid[y-1]
    dn = jnp.where(is_last, 0.0, pltpu.roll(mid, BH - 1, 0))     # row y -> mid[y+1]

    # Single bf16 cast of the concatenated slab, then one MXU matmul.
    lhs2 = jnp.concatenate([up, mid, dn], axis=-1).astype(jnp.bfloat16)
    acc2 = jnp.dot(lhs2, w2_ref[...], preferred_element_type=f32)

    o_ref[...] = jnp.maximum(acc2 * s2 + b2, 0.0)


# ----------------------------------------------------------------- wrapper ---
def make_banded_weights(w_hwio, W):
    """Fold the kw (x) taps of a 3x3 HWIO weight into block-banded matrices.

    Returns (3, W*Ci, W*Co): for each dy, M[x_in*Ci + c, x_out*Co + d] =
    w[dy, dx, c, d] where x_in = x_out + dx - 1 (out-of-range taps dropped,
    which reproduces zero padding along x).
    """
    kh, kw, Ci, Co = w_hwio.shape
    xo = jnp.arange(W)
    mats = []
    for dy in range(kh):
        M = jnp.zeros((W, Ci, W, Co), w_hwio.dtype)
        for dx in range(kw):
            sel = (xo[:, None] == xo[None, :] + (dx - 1)).astype(w_hwio.dtype)
            M = M + sel[:, None, :, None] * w_hwio[dy, dx][None, :, None, :]
        mats.append(M.reshape(W * Ci, W * Co))
    return jnp.stack(mats, axis=0)


def double_conv_pallas(x_nchw, w1_eff, s1, b1, w2_eff, s2, b2):
    """x_nchw: (B, Cin, H, W) float32.  Returns (B, Cout, H, W) float32."""
    B, Cin, H, W = x_nchw.shape
    Cmid = w1_eff.shape[-1]
    Cout = w2_eff.shape[-1]
    WCm, WCo = W * Cmid, W * Cout

    # NCHW -> NHWC -> pad H -> fuse (W, C) lanes -> y-im2col (dy folded into K).
    x_nhwc = jnp.transpose(x_nchw, (0, 2, 3, 1))
    x_pad = jnp.pad(x_nhwc, ((0, 0), (1, 1), (0, 0), (0, 0)))
    xf = x_pad.reshape(B, H + 2, W * Cin)
    xi = jnp.concatenate([xf[:, 0:H], xf[:, 1:H + 1], xf[:, 2:H + 2]], axis=-1)
    xi = xi.reshape(B * H, 3 * W * Cin).astype(jnp.bfloat16)     # (B*H, 3*W*Cin)

    # Banded (kw-folded) weights, dy stacked along K, bf16 for the MXU.
    w1_k = make_banded_weights(w1_eff, W).reshape(3 * W * Cin, WCm).astype(jnp.bfloat16)
    w2_k = make_banded_weights(w2_eff, W).reshape(3 * WCm, WCo).astype(jnp.bfloat16)

    # BN scale/bias packed into a single f32 operand, tiled to lane = x*C + c.
    wc = max(WCm, WCo)
    bn = jnp.zeros((4, wc), jnp.float32)
    bn = bn.at[0, :WCm].set(jnp.tile(s1.astype(jnp.float32), W))
    bn = bn.at[1, :WCm].set(jnp.tile(b1.astype(jnp.float32), W))
    bn = bn.at[2, :WCo].set(jnp.tile(s2.astype(jnp.float32), W))
    bn = bn.at[3, :WCo].set(jnp.tile(b2.astype(jnp.float32), W))

    out_flat = pl.pallas_call(
        functools.partial(_double_conv_kernel, B=B, H=H, WCm=WCm, WCo=WCo),
        out_shape=jax.ShapeDtypeStruct((B * H, WCo), jnp.float32),
        grid_spec=pltpu.PrefetchScalarGridSpec(
            num_scalar_prefetch=0,
            grid=(1,),
            in_specs=[
                pl.BlockSpec((B * H, 3 * W * Cin), lambda i: (0, 0)),
                pl.BlockSpec((3 * W * Cin, WCm), lambda i: (0, 0)),
                pl.BlockSpec((3 * WCm, WCo), lambda i: (0, 0)),
                pl.BlockSpec((4, wc), lambda i: (0, 0)),
            ],
            out_specs=pl.BlockSpec((B * H, WCo), lambda i: (0, 0)),
        ),
        compiler_params=pltpu.CompilerParams(
            dimension_semantics=("arbitrary",),
            vmem_limit_bytes=32 * 1024 * 1024,
        ),
    )(xi, w1_k, w2_k, bn)

    out_nhwc = out_flat.reshape(B, H, W, Cout)
    return jnp.transpose(out_nhwc, (0, 3, 1, 2))                  # NHWC -> NCHW


# ----------------------------------------------------------- param helpers ---
def make_cdc_effective_weight(w_oihw, theta=0.7):
    """Fold Conv2d_cd into a single 3x3 HWIO weight."""
    w_sum = w_oihw.sum(axis=(2, 3))                               # (O, I)
    w_eff = w_oihw.at[:, :, 1, 1].add(-theta * w_sum)
    return jnp.transpose(w_eff, (2, 3, 1, 0))                     # OIHW -> HWIO


def fold_bn(gamma, beta, mean, var, eps=1e-5):
    scale = gamma / jnp.sqrt(var + eps)
    bias = beta - mean * scale
    return scale, bias                                            # (C,), (C,)


def reference_double_conv(x_nchw, w1_eff, s1, b1, w2_eff, s2, b2):
    """Pure-JAX reference matching the kernel's bf16-operand / f32-accumulate
    numerics (inputs, weights and mid rounded to bf16, conv in f32)."""
    rd = lambda a: a.astype(jnp.bfloat16).astype(jnp.float32)

    def conv(x, w):
        return jax.lax.conv_general_dilated(
            x, w, window_strides=(1, 1), padding="SAME",
            dimension_numbers=("NHWC", "HWIO", "NHWC"))

    x = rd(jnp.transpose(x_nchw, (0, 2, 3, 1)))
    h = jnp.maximum(conv(x, rd(w1_eff)) * s1 + b1, 0.0)
    h = rd(h)
    o = jnp.maximum(conv(h, rd(w2_eff)) * s2 + b2, 0.0)
    return jnp.transpose(o, (0, 3, 1, 2))


# --------------------------------------------------------------------- main --
if __name__ == "__main__":
    B, Cin, H, W = 2, 4, 16, 16
    Cout = 8
    Cmid = Cout          # mid_channels defaults to out_channels
    theta = 0.7          # Conv2d_cd default

    key = jax.random.PRNGKey(0)
    ks = jax.random.split(key, 9)

    x = jax.random.normal(ks[0], (B, Cin, H, W), jnp.float32)

    # conv weights (PyTorch OIHW), bias=False
    w1 = jax.random.normal(ks[1], (Cmid, Cin, 3, 3), jnp.float32) * 0.1
    w2 = jax.random.normal(ks[2], (Cout, Cmid, 3, 3), jnp.float32) * 0.1

    # BatchNorm params (eval mode: running stats)
    g1 = 1.0 + 0.1 * jax.random.normal(ks[3], (Cmid,), jnp.float32)
    be1 = 0.1 * jax.random.normal(ks[4], (Cmid,), jnp.float32)
    m1 = 0.05 * jax.random.normal(ks[5], (Cmid,), jnp.float32)
    v1 = 1.0 + 0.1 * jax.random.uniform(ks[6], (Cmid,), jnp.float32)
    g2 = 1.0 + 0.1 * jax.random.normal(ks[7], (Cout,), jnp.float32)
    be2 = 0.1 * jax.random.normal(ks[8], (Cout,), jnp.float32)
    m2 = jnp.zeros((Cout,), jnp.float32)
    v2 = jnp.ones((Cout,), jnp.float32)

    w1_eff = make_cdc_effective_weight(w1, theta)
    w2_eff = make_cdc_effective_weight(w2, theta)
    s1, b1 = fold_bn(g1, be1, m1, v1)
    s2, b2 = fold_bn(g2, be2, m2, v2)

    out = double_conv_pallas(x, w1_eff, s1, b1, w2_eff, s2, b2)
    out = jax.block_until_ready(out)

    ref = reference_double_conv(x, w1_eff, s1, b1, w2_eff, s2, b2)
    assert out.shape == (B, Cout, H, W)
    assert jnp.allclose(out, ref, atol=1e-2, rtol=1e-2), \
        f"max err {jnp.max(jnp.abs(out - ref))}"

    print("KERNEL_OK")
</pallas_src>

<mosaic_0001>
module attributes {stable_mosaic.version = 11 : i64} {
  func.func @_double_conv_kernel(%arg0: i32, %arg1: memref<32x192xbf16, #tpu.memory_space<vmem>>, %arg2: memref<192x128xbf16, #tpu.memory_space<vmem>>, %arg3: memref<384x128xbf16, #tpu.memory_space<vmem>>, %arg4: memref<4x128xf32, #tpu.memory_space<vmem>>, %arg5: memref<32x128xf32, #tpu.memory_space<vmem>>) attributes {dimension_semantics = [#tpu.dimension_semantics<arbitrary>], iteration_bounds = array<i64: 1>, scalar_prefetch = 0 : i64, scratch_operands = 0 : i64, tpu.core_type = #tpu.core_type<tc>, window_params = [{pipeline_mode = #tpu.pipeline_mode<synchronous>, transform_indices = @transform_0, window_bounds = array<i64: 32, 192>}, {pipeline_mode = #tpu.pipeline_mode<synchronous>, transform_indices = @transform_1, window_bounds = array<i64: 192, 128>}, {pipeline_mode = #tpu.pipeline_mode<synchronous>, transform_indices = @transform_2, window_bounds = array<i64: 384, 128>}, {pipeline_mode = #tpu.pipeline_mode<synchronous>, transform_indices = @transform_3, window_bounds = array<i64: 4, 128>}, {pipeline_mode = #tpu.pipeline_mode<synchronous>, transform_indices = @transform_4, window_bounds = array<i64: 32, 128>}]} {
    %c0 = arith.constant 0 : index
    %c0_0 = arith.constant 0 : index
    %0 = vector.load %arg4[%c0, %c0_0] : memref<4x128xf32, #tpu.memory_space<vmem>>, vector<1x128xf32>
    %c1 = arith.constant 1 : index
    %c0_1 = arith.constant 0 : index
    %1 = vector.load %arg4[%c1, %c0_1] : memref<4x128xf32, #tpu.memory_space<vmem>>, vector<1x128xf32>
    %c2 = arith.constant 2 : index
    %c0_2 = arith.constant 0 : index
    %2 = vector.load %arg4[%c2, %c0_2] : memref<4x128xf32, #tpu.memory_space<vmem>>, vector<1x128xf32>
    %c3 = arith.constant 3 : index
    %c0_3 = arith.constant 0 : index
    %3 = vector.load %arg4[%c3, %c0_3] : memref<4x128xf32, #tpu.memory_space<vmem>>, vector<1x128xf32>
    %c0_4 = arith.constant 0 : index
    %c0_5 = arith.constant 0 : index
    %4 = vector.load %arg1[%c0_4, %c0_5] : memref<32x192xbf16, #tpu.memory_space<vmem>>, vector<32x192xbf16>
    %c0_6 = arith.constant 0 : index
    %c0_7 = arith.constant 0 : index
    %5 = vector.load %arg2[%c0_6, %c0_7] : memref<192x128xbf16, #tpu.memory_space<vmem>>, vector<192x128xbf16>
    %cst = arith.constant dense<0.000000e+00> : vector<32x128xf32>
    %6 = tpu.matmul %4, %5, %cst {dimension_numbers = #tpu.dot_dimension_numbers<[1], [0], [0], [1], [0, 0, 1, 1], [], []>} : vector<32x192xbf16>, vector<192x128xbf16>, vector<32x128xf32> -> vector<32x128xf32>
    %7 = vector.broadcast %0 : vector<1x128xf32> to vector<32x128xf32>
    %8 = arith.mulf %6, %7 : vector<32x128xf32>
    %9 = vector.broadcast %1 : vector<1x128xf32> to vector<32x128xf32>
    %10 = arith.addf %8, %9 : vector<32x128xf32>
    %cst_8 = arith.constant 0.000000e+00 : f32
    %11 = vector.broadcast %cst_8 : f32 to vector<32x128xf32>
    %12 = arith.maximumf %10, %11 : vector<32x128xf32>
    %13 = tpu.iota {dimensions = array<i32: 0>} : vector<32x1xi32>
    %c0_i32 = arith.constant 0 : i32
    %14 = vector.broadcast %c0_i32 : i32 to vector<32x1xi32>
    %15 = arith.cmpi eq, %13, %14 : vector<32x1xi32>
    %c15_i32 = arith.constant 15 : i32
    %16 = vector.broadcast %c15_i32 : i32 to vector<32x1xi32>
    %17 = arith.cmpi eq, %13, %16 : vector<32x1xi32>
    %c16_i32 = arith.constant 16 : i32
    %18 = vector.broadcast %c16_i32 : i32 to vector<32x1xi32>
    %19 = arith.cmpi eq, %13, %18 : vector<32x1xi32>
    %20 = arith.ori %15, %19 : vector<32x1xi1>
    %c31_i32 = arith.constant 31 : i32
    %21 = vector.broadcast %c31_i32 : i32 to vector<32x1xi32>
    %22 = arith.cmpi eq, %13, %21 : vector<32x1xi32>
    %23 = arith.ori %17, %22 : vector<32x1xi1>
    %c1_i32 = arith.constant 1 : i32
    %24 = tpu.dynamic_rotate %12 by %c1_i32 dim 0 : vector<32x128xf32>, i32 -> vector<32x128xf32>
    %cst_9 = arith.constant 0.000000e+00 : f32
    %25 = vector.shape_cast %20 : vector<32x1xi1> to vector<32x1xi1>
    %26 = vector.broadcast %25 : vector<32x1xi1> to vector<32x128xi1>
    %27 = vector.broadcast %cst_9 : f32 to vector<32x128xf32>
    %28 = arith.select %26, %27, %24 : vector<32x128xi1>, vector<32x128xf32>
    %c31_i32_10 = arith.constant 31 : i32
    %29 = tpu.dynamic_rotate %12 by %c31_i32_10 dim 0 : vector<32x128xf32>, i32 -> vector<32x128xf32>
    %cst_11 = arith.constant 0.000000e+00 : f32
    %30 = vector.shape_cast %23 : vector<32x1xi1> to vector<32x1xi1>
    %31 = vector.broadcast %30 : vector<32x1xi1> to vector<32x128xi1>
    %32 = vector.broadcast %cst_11 : f32 to vector<32x128xf32>
    %33 = arith.select %31, %32, %29 : vector<32x128xi1>, vector<32x128xf32>
    %34 = tpu.concatenate %28, %12, %33 in 1 : vector<32x128xf32>, vector<32x128xf32>, vector<32x128xf32> -> vector<32x384xf32>
    %35 = arith.truncf %34 : vector<32x384xf32> to vector<32x384xbf16>
    %c0_12 = arith.constant 0 : index
    %c0_13 = arith.constant 0 : index
    %36 = vector.load %arg3[%c0_12, %c0_13] : memref<384x128xbf16, #tpu.memory_space<vmem>>, vector<384x128xbf16>
    %cst_14 = arith.constant dense<0.000000e+00> : vector<32x128xf32>
    %37 = tpu.matmul %35, %36, %cst_14 {dimension_numbers = #tpu.dot_dimension_numbers<[1], [0], [0], [1], [0, 0, 1, 1], [], []>} : vector<32x384xbf16>, vector<384x128xbf16>, vector<32x128xf32> -> vector<32x128xf32>
    %38 = vector.broadcast %2 : vector<1x128xf32> to vector<32x128xf32>
    %39 = arith.mulf %37, %38 : vector<32x128xf32>
    %40 = vector.broadcast %3 : vector<1x128xf32> to vector<32x128xf32>
    %41 = arith.addf %39, %40 : vector<32x128xf32>
    %cst_15 = arith.constant 0.000000e+00 : f32
    %42 = vector.broadcast %cst_15 : f32 to vector<32x128xf32>
    %43 = arith.maximumf %41, %42 : vector<32x128xf32>
    %c0_16 = arith.constant 0 : index
    %c0_17 = arith.constant 0 : index
    %44 = vector.load %arg5[%c0_16, %c0_17] : memref<32x128xf32, #tpu.memory_space<vmem>>, vector<32x128xf32>
    tpu.vector_store %arg5[%c0_16, %c0_17], %43 {strides = array<i32>} : memref<32x128xf32, #tpu.memory_space<vmem>>, vector<32x128xf32>,
    return
  }
  func.func @transform_0(%arg0: i32) -> (i32, i32) {
    %c0_i32 = arith.constant 0 : i32
    %c0_i32_0 = arith.constant 0 : i32
    %c0_i32_1 = arith.constant 0 : i32
    return %c0_i32, %c0_i32_0 : i32, i32
  }
  func.func @transform_1(%arg0: i32) -> (i32, i32) {
    %c0_i32 = arith.constant 0 : i32
    %c0_i32_0 = arith.constant 0 : i32
    %c0_i32_1 = arith.constant 0 : i32
    return %c0_i32, %c0_i32_0 : i32, i32
  }
  func.func @transform_2(%arg0: i32) -> (i32, i32) {
    %c0_i32 = arith.constant 0 : i32
    %c0_i32_0 = arith.constant 0 : i32
    %c0_i32_1 = arith.constant 0 : i32
    return %c0_i32, %c0_i32_0 : i32, i32
  }
  func.func @transform_3(%arg0: i32) -> (i32, i32) {
    %c0_i32 = arith.constant 0 : i32
    %c0_i32_0 = arith.constant 0 : i32
    %c0_i32_1 = arith.constant 0 : i32
    return %c0_i32, %c0_i32_0 : i32, i32
  }
  func.func @transform_4(%arg0: i32) -> (i32, i32) {
    %c0_i32 = arith.constant 0 : i32
    %c0_i32_0 = arith.constant 0 : i32
    %c0_i32_1 = arith.constant 0 : i32
    return %c0_i32, %c0_i32_0 : i32, i32
  }
}

</mosaic_0001>

<bundles_post_ra>
// kernel: tpu_custom_call.1
= control target key start
LH: loop header
LB: loop body
LE: loop exit
PB: predicated region body
PF: predicated region fallthrough
CT: control target
= control target key end

     0   :  { %9 = vsyncpa [#allocation3], 0  ;;  %s1029_s0 = inlined_call_operand.hbm [shape: bf16[32,192], index: 0, kind: input, shape index: {}]   ;;  %s1030_s1 = inlined_call_operand.hbm [shape: bf16[192,128], index: 1, kind: input, shape index: {}]   ;;  %s1031_s2 = inlined_call_operand.hbm [shape: bf16[384,128], index: 2, kind: input, shape index: {}]   ;;  %s1032_s3 = inlined_call_operand.vmem [shape: f32[4,128], index: 3, kind: input, shape index: {}]   ;;  %s1033_s4 = inlined_call_operand.hbm [shape: f32[32,128], index: 4, kind: output, shape index: {}]  }
   0x1   :  { %10 = vsyncpa [#allocation6], 0 }
   0x2   :  { %11 = vsyncpa [#allocation4], 0  ;;  %s929_s15 = smov [#allocation5]  }
   0x3   :  { %s29_s16 = sshll.u32 %s929_s15, 4  ;;  %s30_s16 = int_to_ptr.vmem [resolvable:$true] %s29_s16 }
   0x4   :  { %s851_s17 = scalar_lea.vmem %s30_s16, 1536  ;;  %p856_p1 = scmp.lt.s32.totalorder %s30_s16, %s30_s16 }
   0x5   :  { %p852_p0 = scmp.ne.s32.totalorder %s30_s16, %s851_s17  ;;  %p857_p2 = scmp.lt.s32.totalorder %s851_s17, %s851_s17 }
   0x7   :  { %p858_p3 = por %p857_p2, %p856_p1 }
   0x9   :  { %p859_p4 = pnand %p858_p3, %p852_p0 }
   0xb   :  { %862 = shalt.err (!%p859_p4)
}
   0xc   :  { %s930_s18 = smov 64   ;;  %s931_s19 = smov 4  }
   0xd   :  { %35 = dma.hbm_to_vmem [thread:$0]  %s1030_s1, 1536, %s30_s16, [#allocation6], %s930_s18, %s930_s18, %s931_s19  }
   0xe   :  { %s932_s22 = smov [#allocation2]  }
   0xf   :  { %s17_s23 = sshll.u32 %s932_s22, 4  ;;  %s18_s23 = int_to_ptr.vmem [resolvable:$true] %s17_s23 }
  0x10   :  { %s871_s24 = scalar_lea.vmem %s18_s23, 512  ;;  %p876_p6 = scmp.lt.s32.totalorder %s18_s23, %s18_s23 }
  0x11   :  { %p872_p5 = scmp.ne.s32.totalorder %s18_s23, %s871_s24  ;;  %p877_p7 = scmp.lt.s32.totalorder %s871_s24, %s871_s24 }
  0x13   :  { %p878_p8 = por %p877_p7, %p876_p6 }
  0x15   :  { %p879_p9 = pnand %p878_p8, %p872_p5 }
  0x17   :  { %882 = shalt.err (!%p879_p9)
}
  0x18   :  { %s933_s25 = smov 128   ;;  %s934_s26 = smov 8  }
  0x19   :  { %23 = dma.hbm_to_vmem [thread:$0]  %s1029_s0, 512, %s18_s23, [#allocation3], %s933_s25, %s933_s25, %s934_s26  }
  0x1a   :  { %s935_s1 = smov [#allocation7]  }
  0x1b   :  { %s41_s29 = sshll.u32 %s935_s1, 4  ;;  %s42_s29 = int_to_ptr.vmem [resolvable:$true] %s41_s29 }
  0x1c   :  { %s891_s30 = scalar_lea.vmem %s42_s29, 3072  ;;  %p896_p11 = scmp.lt.s32.totalorder %s42_s29, %s42_s29 }
  0x1d   :  { %p892_p10 = scmp.ne.s32.totalorder %s42_s29, %s891_s30  ;;  %p897_p12 = scmp.lt.s32.totalorder %s891_s30, %s891_s30 }
  0x1f   :  { %p898_p13 = por %p897_p12, %p896_p11 }
  0x21   :  { %p899_p0 = pnand %p898_p13, %p892_p10 }
  0x23   :  { %902 = shalt.err (!%p899_p0)
}
  0x24   :  { %47 = dma.hbm_to_vmem [thread:$0]  %s1031_s2, 3072, %s42_s29, [#allocation6], %s930_s18, %s930_s18, %s931_s19  }
  0x25   :  { %923 = dma.done.wait [#allocation3], 512  }
  0x26   :  { %924 = vsyncadd [#allocation3], 4294966784 }
  0x27   :  { %925 = dma.done.wait [#allocation6], 4608  }
  0x28   :  { %926 = vsyncadd [#allocation6], 4294962688  ;;  %v936_v0 = vmov 0   ;;  %v801_v1 = vld [vmem:[#allocation5 + $0x38] sm:$0xff]   ;;  %v802_v2 = vld [vmem:[#allocation5 + $0x30] sm:$0xff]   ;;  %vm182_vm0 = vcmask 523264   ;;  %v258_v48 = vlaneseq }
  0x29   :  { %189 = vmatprep.subr.bf16.mxu0 %v936_v0  ;;  %v803_v3 = vld [vmem:[#allocation5 + $0x28] sm:$0xff]   ;;  %v804_v4 = vld [vmem:[#allocation5 + $0x20] sm:$0xff]   ;;  %v805_v6 = vld [vmem:[#allocation5 + $0x18] sm:$0xff]   ;;  %vm937_vm3 = vmmov 1   ;;  %s938_s13 = smov [#allocation8]  }
  0x2a   :  { %190 = vmatpush1.bf16.msra.mxu0 %v801_v1  ;;  %v815_v5 = vld [vmem:[#allocation2 + $0x4] ss:$8 sps:$4 sm:$0xff]   ;;  %v819_v7 = vld [vmem:[#allocation7 + $0x78] sm:$0xff]   ;;  %v806_v8 = vld [vmem:[#allocation5 + $0x10] sm:$0xff]   ;;  %v987_v53 = vshrl.u32 %v258_v48, 7 }
  0x2b   :  { %191 = vmatprep.subr.bf16.mxu0 %v936_v0  ;;  %683 = vmatprep.mubr.msk.bf16.mxu0 %vm182_vm0, %v815_v5  ;;  %v820_v9 = vld [vmem:[#allocation7 + $0x38] sm:$0xff]   ;;  %v821_v10 = vld [vmem:[#allocation7 + $0x70] sm:$0xff]   ;;  %v823_v12 = vld [vmem:[#allocation7 + $0x68] sm:$0xff]  }
  0x2c   :  { %733 = vmatprep.subr.bf16.mxu1 %v819_v7  ;;  %v822_v11 = vld [vmem:[#allocation7 + $0x30] sm:$0xff]   ;;  %v807_v13 = vld [vmem:[#allocation5 + $0x8] sm:$0xff]   ;;  %v808_v14 = vld [vmem:[#allocation5] sm:$0xff]   ;;  %vm291_vm1 = vcmp.lt.s32.totalorder %v987_v53, 1  ;;  %vm729_vm2 = vcmp.ne.s32.totalorder %v987_v53, 0  ;;  %vm312_vm6 = vcmp.lt.s32.totalorder %v987_v53, 7 }
  0x2d   :  { %734 = vmatpush3.bf16.msra.mxu1 %v820_v9  ;;  %v809_v15 = vld [vmem:[#allocation5 + $0x58] sm:$0xff]   ;;  %v810_v16 = vld [vmem:[#allocation5 + $0x50] sm:$0xff]   ;;  %v811_v17 = vld [vmem:[#allocation5 + $0x48] sm:$0xff]  }
  0x2e   :  { %192 = vmatpush1.bf16.msra.mxu0 %v802_v2  ;;  %735 = vmatprep.subr.bf16.mxu1 %v821_v10  ;;  %v812_v18 = vld [vmem:[#allocation5 + $0x40] sm:$0xff]   ;;  %v816_v20 = vld [vmem:[#allocation2 + $0x14] ss:$8 sps:$4 sm:$0xff]   ;;  %v818_v21 = vld [vmem:[#allocation2 + $0x10] ss:$8 sps:$4 sm:$0xff]   ;;  %v261_v2 = vadd.s32 16, %v987_v53 }
  0x2f   :  { %193 = vmatprep.subr.bf16.mxu0 %v936_v0  ;;  %v813_v19 = vld [vmem:[#allocation2] ss:$8 sps:$4 sm:$0xff]   ;;  %v827_v25 = vld [vmem:[#allocation7 + $0x58] sm:$0xff]   ;;  %v829_v27 = vld [vmem:[#allocation7 + $0x50] sm:$0xff]  }
  0x30   :  { %v824_v22 = vld [vmem:[#allocation7 + $0x28] sm:$0xff]   ;;  %v825_v23 = vld [vmem:[#allocation7 + $0x60] sm:$0xff]   ;;  %v828_v26 = vld [vmem:[#allocation7 + $0x18] sm:$0xff]   ;;  %vm730_vm5 = vcmp.ne.s32.totalorder %v261_v2, 16 }
  0x31   :  { %736 = vmatpush3.bf16.msra.mxu1 %v822_v11  ;;  %v826_v24 = vld [vmem:[#allocation7 + $0x20] sm:$0xff]   ;;  %v830_v28 = vld [vmem:[#allocation7 + $0x10] sm:$0xff]   ;;  %v831_v29 = vld [vmem:[#allocation7 + $0x48] sm:$0xff]  }
  0x32   :  { %194 = vmatpush1.bf16.msra.mxu0 %v803_v3  ;;  %737 = vmatprep.subr.bf16.mxu1 %v823_v12  ;;  %v832_v30 = vld [vmem:[#allocation7 + $0x8] sm:$0xff]   ;;  %v833_v31 = vld [vmem:[#allocation7 + $0x40] sm:$0xff]   ;;  %v835_v33 = vld [vmem:[#allocation7 + $0xb8] sm:$0xff]  }
  0x33   :  { %195 = vmatprep.subr.bf16.mxu0 %v936_v0  ;;  %v834_v32 = vld [vmem:[#allocation7] sm:$0xff]   ;;  %vm712_vm4 = vmpackc.low %vm937_vm3, %vm729_vm2  ;;  %v836_v1 = vld [vmem:[#allocation7 + $0xb0] sm:$0xff]  }
  0x34   :  { %v685_v34 = vld [vmem:[%s1032_s3] ss:$0 sm:$0xff]  ;;  %v686_v37 = vld [vmem:[%s1032_s3 + $0x1] ss:$0 sm:$0xff]  ;;  %vm716_vm8 = vmpackc.low %vm937_vm3, %vm730_vm5 }
  0x35   :  { %738 = vmatpush3.bf16.msra.mxu1 %v824_v22 }
  0x36   :  { %196 = vmatpush1.bf16.msra.mxu0 %v804_v4  ;;  %739 = vmatprep.subr.bf16.mxu1 %v825_v23  ;;  %v260_v4 = vadd.s32 8, %v987_v53 }
  0x37   :  { %197 = vmatprep.subr.bf16.mxu0 %v936_v0 }
  0x38   :  { %vm731_vm7 = vcmp.ne.s32.totalorder %v260_v4, 15 }
  0x39   :  { %740 = vmatpush3.bf16.msra.mxu1 %v826_v24  ;;  %vm720_vm9 = vmpackc.low %vm731_vm7, %vm937_vm3 }
  0x3a   :  { %198 = vmatpush1.bf16.msra.mxu0 %v805_v6  ;;  %741 = vmatprep.subr.bf16.mxu1 %v827_v25 }
  0x3b   :  { %199 = vmatprep.subr.bf16.mxu0 %v936_v0 }
  0x3d   :  { %742 = vmatpush3.bf16.msra.mxu1 %v828_v26 }
  0x3e   :  { %200 = vmatpush1.bf16.msra.mxu0 %v806_v8  ;;  %743 = vmatprep.subr.bf16.mxu1 %v829_v27  ;;  %v837_v8 = vld [vmem:[#allocation7 + $0xa8] sm:$0xff]  }
  0x3f   :  { %201 = vmatprep.subr.bf16.mxu0 %v936_v0 }
  0x41   :  { %744 = vmatpush3.bf16.msra.mxu1 %v830_v28 }
  0x42   :  { %202 = vmatpush1.bf16.msra.mxu0 %v807_v13  ;;  %745 = vmatprep.subr.bf16.mxu1 %v831_v29 }
  0x43   :  { %203 = vmatprep.subr.bf16.mxu0 %v936_v0 }
  0x45   :  { %746 = vmatpush3.bf16.msra.mxu1 %v832_v30 }
  0x46   :  { %204 = vmatpush1.bf16.msra.mxu0 %v808_v14  ;;  %747 = vmatprep.subr.bf16.mxu1 %v833_v31 }
  0x47   :  { %213 = vmatprep.subr.bf16.mxu0 %v936_v0 }
  0x49   :  { %748 = vmatpush3.bf16.msra.mxu1 %v834_v32 }
  0x4a   :  { %214 = vmatpush2.bf16.msra.mxu0 %v809_v15  ;;  %771 = vmatprep.subr.bf16.mxu1 %v835_v33  ;;  %v838_v15 = vld [vmem:[#allocation7 + $0xa0] sm:$0xff]  }
  0x4b   :  { %215 = vmatprep.subr.bf16.mxu0 %v936_v0 }
  0x4e   :  { %216 = vmatpush2.bf16.msra.mxu0 %v810_v16 }
  0x4f   :  { %217 = vmatprep.subr.bf16.mxu0 %v936_v0 }
  0x52   :  { %218 = vmatpush2.bf16.msra.mxu0 %v811_v17  ;;  %v839_v17 = vld [vmem:[#allocation7 + $0x98] sm:$0xff]  }
  0x53   :  { %219 = vmatprep.subr.bf16.mxu0 %v936_v0 }
  0x56   :  { %220 = vmatpush2.bf16.msra.mxu0 %v812_v18  ;;  %v840_v18 = vld [vmem:[#allocation7 + $0x90] sm:$0xff]  }
  0x59   :  { %222 = vmatmul.mubr.bf16.vlgmr.msra.gmra.mxu0 %v813_v19  ;;  %v841_v19 = vld [vmem:[#allocation7 + $0x88] sm:$0xff]  }
  0x5a   :  { %684 = vmatprep.mubr.msk.bf16.mxu0 %vm182_vm0, %v816_v20  ;;  %v842_v20 = vld [vmem:[#allocation7 + $0x80] sm:$0xff]  }
  0x61   :  { %230 = vmatmul.mubr.bf16.gmra.mxu0 %v818_v21  ;;  %v262_v21 = vadd.s32 24, %v987_v53 }
  0x63   :  { %vm732_vm10 = vcmp.ne.s32.totalorder %v262_v21, 31 }
  0x64   :  { %vm724_vm11 = vmpackc.low %vm732_vm10, %vm937_vm3 }
 0x119   :  { %v223_v35 = vpop.f32.mrf.mxu0 }
 0x11a   :  { %v242_v36 = vmul.f32 %v685_v34, %v223_v35  ;;  %v727_v35 = vld [vmem:[%s1032_s3 + $0x2] ss:$0 sm:$0xff] }
 0x11b   :  { %v225_v38 = vpop.f32.mrf.mxu0 }
 0x11c   :  { %v250_v40 = vadd.f32 %v686_v37, %v242_v36 }
 0x11d   :  { %v226_v39 = vpop.f32.mrf.mxu0 }
 0x11e   :  { %v243_v41 = vmul.f32 %v685_v34, %v226_v39  ;;  %v984_v45 = vmax.f32 %v250_v40, 0.0  ;;  %v728_v39 = vld [vmem:[%s1032_s3 + $0x3] ss:$0 sm:$0xff]  ;;  %s654_s3 = sshll.u32 %s938_s13, 4  ;;  %s655_s3 = int_to_ptr.vmem [resolvable:$true] %s654_s3 }
 0x11f   :  { %v228_v42 = vpop.f32.mrf.mxu0  ;;  %s903_s14 = scalar_lea.vmem %s655_s3, 512  ;;  %p908_p2 = scmp.lt.s32.totalorder %s655_s3, %s655_s3 }
 0x120   :  { %v251_v43 = vadd.f32 %v686_v37, %v243_v41  ;;  %v287_v59 = vrot.slane %v984_v45, 7  ;;  %v308_v10 = vrot.slane %v984_v45, 1  ;;  %p904_p1 = scmp.ne.s32.totalorder %s655_s3, %s903_s14  ;;  %p909_p3 = scmp.lt.s32.totalorder %s903_s14, %s903_s14 }
 0x121   :  { %v231_v44 = vpop.f32.mrf.mxu0 }
 0x122   :  { %v255_v46 = vmax.f32 %v251_v43, 0.0  ;;  %v244_v50 = vmul.f32 %v685_v34, %v231_v44  ;;  %p910_p4 = por %p909_p3, %p908_p2 }
 0x123   :  { %v233_v47 = vpop.f32.mrf.mxu0 }
 0x124   :  { %v330_v49 = vpack.c.bf16 %v255_v46, %v984_v45  ;;  %v252_v56 = vadd.f32 %v686_v37, %v244_v50  ;;  %v288_v57 = vrot.slane %v255_v46, 7  ;;  %v309_v7 = vrot.slane %v255_v46, 1  ;;  %p911_p5 = pnand %p910_p4, %p904_p1 }
 0x125   :  { %v234_v51 = vpop.f32.mrf.mxu0 }
 0x126   :  { %v245_v52 = vmul.f32 %v685_v34, %v234_v51  ;;  %559 = vmatprep.mubr.bf16.mxu1 %v330_v49  ;;  %v256_v61 = vmax.f32 %v252_v56, 0.0  ;;  %v294_v62 = vsel %vm291_vm1, %v287_v59, %v288_v57  ;;  %v315_v14 = vsel %vm312_vm6, %v308_v10, %v309_v7 }
 0x127   :  { %v236_v54 = vpop.f32.mrf.mxu0 }
 0x128   :  { %v253_v55 = vadd.f32 %v686_v37, %v245_v52  ;;  %v310_v5 = vrot.slane %v256_v61, 1  ;;  %v289_v6 = vrot.slane %v256_v61, 7 }
 0x12a   :  { %v257_v58 = vmax.f32 %v253_v55, 0.0  ;;  %v314_v11 = vsel %vm312_vm6, %v309_v7, %v310_v5  ;;  %v293_v12 = vsel %vm291_vm1, %v288_v57, %v289_v6 }
 0x12b   :  { %v721_v16 = vpack.c.bf16 %v314_v11, %v315_v14 }
 0x12c   :  { %v290_v60 = vrot.slane %v257_v58, 7  ;;  %v333_v3 = vpack.c.bf16 %v257_v58, %v256_v61  ;;  %v311_v22 = vrot.slane %v257_v58, 1 }
 0x12e   :  { %v295_v63 = vsel %vm291_vm1, %v290_v60, %v287_v59  ;;  %v292_v9 = vsel %vm291_vm1, %v289_v6, %v290_v60  ;;  %v313_v23 = vsel %vm312_vm6, %v310_v5, %v311_v22  ;;  %v316_v24 = vsel %vm312_vm6, %v311_v22, %v308_v10 }
 0x12f   :  { %v713_v0 = vpack.c.bf16 %v294_v62, %v295_v63  ;;  %v717_v13 = vpack.c.bf16 %v292_v9, %v293_v12  ;;  %v725_v25 = vpack.c.bf16 %v316_v24, %v313_v23 }
 0x131   :  { %714 = vmatmul.mubr.msk.bf16.vlgmr.msra.gmra.mxu1 %vm712_vm4, %v713_v0 }
 0x132   :  { %772 = vmatpush3.bf16.msra.mxu1 %v835_v33  ;;  %567 = vmatprep.mubr.bf16.mxu1 %v333_v3 }
 0x133   :  { %773 = vmatprep.subr.bf16.mxu1 %v836_v1 }
 0x136   :  { %774 = vmatpush3.bf16.msra.mxu1 %v836_v1 }
 0x137   :  { %775 = vmatprep.subr.bf16.mxu1 %v837_v8 }
 0x139   :  { %718 = vmatmul.mubr.msk.bf16.gmra.mxu1 %vm716_vm8, %v717_v13 }
 0x13a   :  { %776 = vmatpush3.bf16.msra.mxu1 %v837_v8  ;;  %787 = vmatprep.mubr.msk.bf16.mxu1 %vm720_vm9, %v721_v16 }
 0x13b   :  { %777 = vmatprep.subr.bf16.mxu1 %v838_v15 }
 0x13e   :  { %778 = vmatpush3.bf16.msra.mxu1 %v838_v15 }
 0x13f   :  { %779 = vmatprep.subr.bf16.mxu1 %v839_v17 }
 0x142   :  { %780 = vmatpush3.bf16.msra.mxu1 %v839_v17 }
 0x143   :  { %781 = vmatprep.subr.bf16.mxu1 %v840_v18 }
 0x146   :  { %782 = vmatpush3.bf16.msra.mxu1 %v840_v18 }
 0x147   :  { %783 = vmatprep.subr.bf16.mxu1 %v841_v19 }
 0x14a   :  { %784 = vmatpush3.bf16.msra.mxu1 %v841_v19 }
 0x14b   :  { %785 = vmatprep.subr.bf16.mxu1 %v842_v20 }
 0x14e   :  { %786 = vmatpush3.bf16.msra.mxu1 %v842_v20 }
 0x151   :  { %788 = vmatmul.mubr.msk.bf16.vlgmr.msra.gmra.mxu1 %vm724_vm11, %v725_v25 }
 0x1f1   :  { %v749_v26 = vpop.f32.mrf.mxu1 }
 0x1f3   :  { %v750_v27 = vpop.f32.mrf.mxu1 }
 0x1f4   :  { %v751_v37 = vadd.f32 %v750_v27, %v749_v26 }
 0x1f5   :  { %v752_v28 = vpop.f32.mrf.mxu1 }
 0x1f7   :  { %v753_v29 = vpop.f32.mrf.mxu1 }
 0x1f8   :  { %v754_v45 = vadd.f32 %v753_v29, %v752_v28 }
 0x1f9   :  { %v755_v30 = vpop.f32.mrf.mxu1 }
 0x1fb   :  { %v756_v31 = vpop.f32.mrf.mxu1 }
 0x1fc   :  { %v757_v34 = vadd.f32 %v756_v31, %v755_v30 }
 0x1fd   :  { %v758_v32 = vpop.f32.mrf.mxu1 }
 0x1ff   :  { %v759_v33 = vpop.f32.mrf.mxu1 }
 0x200   :  { %v760_v41 = vadd.f32 %v759_v33, %v758_v32 }
 0x211   :  { %v789_v36 = vpop.f32.mrf.mxu1 }
 0x212   :  { %v619_v38 = vadd.f32 %v789_v36, %v757_v34 }
 0x213   :  { %v610_v40 = vpop.f32.mrf.mxu1 }
 0x214   :  { %v631_v42 = vmul.f32 %v727_v35, %v619_v38  ;;  %v611_v43 = vadd.f32 %v751_v37, %v610_v40 }
 0x215   :  { %v790_v44 = vpop.f32.mrf.mxu1 }
 0x216   :  { %v639_v46 = vadd.f32 %v728_v39, %v631_v42  ;;  %v629_v47 = vmul.f32 %v727_v35, %v611_v43  ;;  %v622_v48 = vadd.f32 %v790_v44, %v760_v41 }
 0x217   :  { %v613_v49 = vpop.f32.mrf.mxu1 }
 0x218   :  { %v643_v50 = vmax.f32 %v639_v46, 0.0  ;;  %v637_v51 = vadd.f32 %v728_v39, %v629_v47  ;;  %v632_v52 = vmul.f32 %v727_v35, %v622_v48  ;;  %v614_v53 = vadd.f32 %v754_v45, %v613_v49 }
 0x21a   :  { %647 = vst [vmem:[#allocation8 + $0x10] sm:$0xff] %v643_v50  ;;  %v641_v54 = vmax.f32 %v637_v51, 0.0  ;;  %v640_v55 = vadd.f32 %v728_v39, %v632_v52  ;;  %v630_v56 = vmul.f32 %v727_v35, %v614_v53 }
 0x21c   :  { %645 = vst [vmem:[#allocation8] sm:$0xff] %v641_v54  ;;  %v644_v57 = vmax.f32 %v640_v55, 0.0  ;;  %v638_v58 = vadd.f32 %v728_v39, %v630_v56 }
 0x21e   :  { %648 = vst [vmem:[#allocation8 + $0x18] sm:$0xff] %v644_v57  ;;  %v642_v59 = vmax.f32 %v638_v58, 0.0 }
 0x220   :  { %646 = vst [vmem:[#allocation8 + $0x8] sm:$0xff] %v642_v59 }
 0x221   :  { %914 = shalt.err (!%p911_p5)
}
 0x222   :  { %660 = dma.vmem_to_hbm [thread:$0]  %s655_s3, 512, %s1033_s4, [#allocation4], %s933_s25, %s933_s25, %s934_s26  }
 0x223   :  { %927 = dma.done.wait [#allocation4], 512  }
 0x224   :  { %928 = vsyncadd [#allocation4], 4294966784 }
 0x225   :  { %664 = vsyncpa [#allocation3], 1 }
 0x226   :  { %665 = vsyncpa [#allocation6], 1 }
 0x227   :  { %666 = vsyncpa [#allocation4], 1 }

</bundles_post_ra>
